<compile_context>
chip_gen: v5e
topology: v5e:2x2
jax: 0.10.0
libtpu: 0.0.40
codegen_flags: <defaults>
</compile_context>

<pallas_src>
import numpy as np
import jax
import jax.numpy as jnp
from jax.experimental import pallas as pl
from jax.experimental.pallas import tpu as pltpu


def _ssn_ce_kernel(mu_ref, std_ref, eps_ref, out_ref, acc_ref):
    """Grid = (pixel_tile i, antithetic pair k); k is the reduction axis (innermost)."""
    k = pl.program_id(1)

    @pl.when(k == 0)
    def _():
        acc_ref[...] = jnp.zeros_like(acc_ref)

    mu = mu_ref[...]                            # (C, TN) f32
    std = std_ref[...]                          # (C, TN) f32
    eps = eps_ref[0].astype(jnp.float32)        # (C, TN)  bf16 -> f32

    noise = std * eps
    lp = mu + noise                             # sample with +eps
    lm = mu - noise                             # antithetic sample with -eps

    mp = jnp.max(lp, axis=0, keepdims=True)     # (1, TN)
    mm = jnp.max(lm, axis=0, keepdims=True)     # (1, TN)

    # Pack the antithetic pair along the sublane axis so exp() runs on dense (2C, TN)
    # vregs (with C=4, 2C=8 fills the f32 sublane group).
    shifted = jnp.concatenate([lp - mp, lm - mm], axis=0)    # (2C, TN)
    e = jnp.exp(shifted)

    num_classes = mu.shape[0]
    sp = jnp.sum(e[:num_classes], axis=0, keepdims=True)     # (1, TN)
    sm = jnp.sum(e[num_classes:], axis=0, keepdims=True)     # (1, TN)

    # Pair-summed logsumexp per pixel; sp, sm >= 1 so fusing the logs is safe.
    # Target term is hoisted to the wrapper (exact cancellation across the pair).
    acc_ref[...] += jnp.log(sp * sm) + mp + mm               # lane-dense VPU add

    @pl.when(k == pl.num_programs(1) - 1)
    def _():
        acc = acc_ref[...]                      # (1, TN)
        n_chunks = acc.shape[1] // 128
        total = acc[:, 0:128]
        for j in range(1, n_chunks):            # static, vreg-aligned lane slices
            total = total + acc[:, j * 128:(j + 1) * 128]
        out_ref[...] = total[None]              # (1, 1, 128) lane-dense partial


def _pick_pixel_tile(n, max_tile=2048):
    assert n % 128 == 0, "pixel count must be a multiple of 128"
    tn = min(n, max_tile)
    while n % tn:
        tn -= 128
    return tn


def ssn_sample_ce_loss(mu, std, eps_bf16, target_onehot, *, num_samples):
    """mu, std, target_onehot: (C, N) f32.  eps_bf16: (S//2, C, N) bf16.  Returns scalar."""
    assert num_samples % 2 == 0          # matches the PyTorch assert
    C, N = mu.shape
    half = num_samples // 2
    assert eps_bf16.shape == (half, C, N)

    TN = _pick_pixel_tile(N)
    n_tiles = N // TN

    lse_partials = pl.pallas_call(
        _ssn_ce_kernel,
        out_shape=jax.ShapeDtypeStruct((n_tiles, 1, 128), jnp.float32),
        grid_spec=pltpu.PrefetchScalarGridSpec(
            num_scalar_prefetch=0,
            grid=(n_tiles, half),
            in_specs=[
                pl.BlockSpec((C, TN), lambda i, k: (0, i)),        # mu (resident per tile)
                pl.BlockSpec((C, TN), lambda i, k: (0, i)),        # std (resident per tile)
                pl.BlockSpec((1, C, TN), lambda i, k: (k, 0, i)),  # eps pair k (bf16 stream)
            ],
            out_specs=pl.BlockSpec((1, 1, 128), lambda i, k: (i, 0, 0)),
            scratch_shapes=[pltpu.VMEM((1, TN), jnp.float32)],     # per-pixel lse accumulator
        ),
        compiler_params=pltpu.CompilerParams(
            dimension_semantics=("parallel", "arbitrary")),
    )(mu, std, eps_bf16)

    # Hoisted target term: for an antithetic pair the +/- std*eps parts of tgt.logits
    # cancel exactly, so  sum_s sum_n tgt.logits == num_samples * sum_n tgt.mu.
    tgt_mu_sum = jnp.sum(target_onehot * mu)
    total_lse = jnp.sum(lse_partials)
    return (total_lse - num_samples * tgt_mu_sum) / (num_samples * N)


def ssn_sample_ce_loss_reference(mu, std, eps, target_onehot, *, num_samples):
    """Plain-JAX reference mirroring the PyTorch wrapper semantics (no hoisting)."""
    noise = std[None] * eps                                       # (half, C, N)
    samples = jnp.concatenate([mu[None] + noise, mu[None] - noise], axis=0)  # (S, C, N)

    def ce_mean(logits):
        lse = jax.scipy.special.logsumexp(logits, axis=0)         # (N,)
        tlogit = jnp.sum(target_onehot * logits, axis=0)          # (N,)
        return jnp.mean(lse - tlogit)

    losses = jax.vmap(ce_mean)(samples)
    return jnp.sum(losses) / num_samples


if __name__ == "__main__":
    # Small shapes consistent with the module's forward (segmentation logits).
    B, C, H, W = 2, 4, 16, 16
    S = 10                       # self.samples (must be even)
    N = B * H * W                # 512 pixels, lane-dense (multiple of 128)

    key = jax.random.PRNGKey(0)
    k_mu, k_logsig, k_eps, k_tgt = jax.random.split(key, 4)

    # Synthetic diagonal-Normal distribution parameters (stand-in for
    # result_dict['distribution']) and reparameterization noise.
    mu_nchw = jax.random.normal(k_mu, (B, C, H, W), dtype=jnp.float32)
    std_nchw = jnp.exp(0.1 * jax.random.normal(k_logsig, (B, C, H, W), dtype=jnp.float32))
    target_nhw = jax.random.randint(k_tgt, (B, H, W), 0, C)
    eps = jax.random.normal(k_eps, (S // 2, B, C, H, W), dtype=jnp.float32)

    # NCHW -> (C, N) channel-major / pixel-flattened layout (plain-JAX glue)
    def to_cn(x):  # (B, C, H, W) -> (C, B*H*W)
        return jnp.transpose(x, (1, 0, 2, 3)).reshape(C, N)

    mu_cn = to_cn(mu_nchw)
    std_cn = to_cn(std_nchw)
    eps_cn_bf16 = jax.vmap(to_cn)(eps).astype(jnp.bfloat16)            # (S//2, C, N) bf16
    tgt_onehot = jax.nn.one_hot(target_nhw.reshape(-1), C, dtype=jnp.float32).T  # (C, N)

    loss = jax.block_until_ready(
        ssn_sample_ce_loss(mu_cn, std_cn, eps_cn_bf16, tgt_onehot, num_samples=S))

    # Reference sees exactly the same eps values the kernel computes with.
    eps_ref_f32 = eps_cn_bf16.astype(jnp.float32)
    ref = jax.block_until_ready(
        ssn_sample_ce_loss_reference(mu_cn, std_cn, eps_ref_f32, tgt_onehot, num_samples=S))

    np.testing.assert_allclose(np.asarray(loss), np.asarray(ref), rtol=2e-5, atol=1e-5)
    print("KERNEL_OK")
</pallas_src>

<mosaic_0001>
module attributes {stable_mosaic.version = 11 : i64} {
  func.func @_ssn_ce_kernel(%arg0: i32, %arg1: i32, %arg2: memref<4x512xf32, #tpu.memory_space<vmem>>, %arg3: memref<4x512xf32, #tpu.memory_space<vmem>>, %arg4: memref<1x4x512xbf16, #tpu.memory_space<vmem>>, %arg5: memref<1x1x128xf32, #tpu.memory_space<vmem>>, %arg6: memref<1x512xf32, #tpu.memory_space<vmem>>) attributes {dimension_semantics = [#tpu.dimension_semantics<parallel>, #tpu.dimension_semantics<arbitrary>], iteration_bounds = array<i64: 1, 5>, scalar_prefetch = 0 : i64, scratch_operands = 1 : i64, tpu.core_type = #tpu.core_type<tc>, window_params = [{transform_indices = @transform_0, window_bounds = array<i64: 4, 512>}, {transform_indices = @transform_1, window_bounds = array<i64: 4, 512>}, {transform_indices = @transform_2, window_bounds = array<i64: 1, 4, 512>}, {transform_indices = @transform_3, window_bounds = array<i64: 1, 1, 128>}]} {
    %c0_i32 = arith.constant 0 : i32
    %0 = arith.cmpi eq, %arg1, %c0_i32 : i32
    %1 = arith.extui %0 : i1 to i32
    %c0_i32_0 = arith.constant 0 : i32
    %2 = arith.cmpi ne, %1, %c0_i32_0 : i32
    scf.if %2 {
      %cst_15 = arith.constant 0.000000e+00 : f32
      %37 = vector.broadcast %cst_15 : f32 to vector<1x512xf32>
      %c0_16 = arith.constant 0 : index
      %c0_17 = arith.constant 0 : index
      %38 = vector.load %arg6[%c0_16, %c0_17] : memref<1x512xf32, #tpu.memory_space<vmem>>, vector<1x512xf32>
      tpu.vector_store %arg6[%c0_16, %c0_17], %37 {strides = array<i32>} : memref<1x512xf32, #tpu.memory_space<vmem>>, vector<1x512xf32>,
    } else {
    }
    %c0 = arith.constant 0 : index
    %c0_1 = arith.constant 0 : index
    %3 = vector.load %arg2[%c0, %c0_1] : memref<4x512xf32, #tpu.memory_space<vmem>>, vector<4x512xf32>
    %c0_2 = arith.constant 0 : index
    %c0_3 = arith.constant 0 : index
    %4 = vector.load %arg3[%c0_2, %c0_3] : memref<4x512xf32, #tpu.memory_space<vmem>>, vector<4x512xf32>
    %c0_4 = arith.constant 0 : index
    %c0_5 = arith.constant 0 : index
    %c0_6 = arith.constant 0 : index
    %5 = vector.load %arg4[%c0_4, %c0_5, %c0_6] : memref<1x4x512xbf16, #tpu.memory_space<vmem>>, vector<1x4x512xbf16>
    %6 = vector.shape_cast %5 : vector<1x4x512xbf16> to vector<4x512xbf16>
    %7 = arith.extf %6 : vector<4x512xbf16> to vector<4x512xf32>
    %8 = arith.mulf %4, %7 : vector<4x512xf32>
    %9 = arith.addf %3, %8 : vector<4x512xf32>
    %10 = arith.subf %3, %8 : vector<4x512xf32>
    %cst = arith.constant dense<0xFF800000> : vector<512xf32>
    %11 = vector.multi_reduction <maximumf>, %9, %cst [0] : vector<4x512xf32> to vector<512xf32>
    %12 = vector.shape_cast %11 : vector<512xf32> to vector<1x512xf32>
    %cst_7 = arith.constant dense<0xFF800000> : vector<512xf32>
    %13 = vector.multi_reduction <maximumf>, %10, %cst_7 [0] : vector<4x512xf32> to vector<512xf32>
    %14 = vector.shape_cast %13 : vector<512xf32> to vector<1x512xf32>
    %15 = vector.broadcast %12 : vector<1x512xf32> to vector<4x512xf32>
    %16 = arith.subf %9, %15 : vector<4x512xf32>
    %17 = vector.broadcast %14 : vector<1x512xf32> to vector<4x512xf32>
    %18 = arith.subf %10, %17 : vector<4x512xf32>
    %19 = tpu.concatenate %16, %18 in 0 : vector<4x512xf32>, vector<4x512xf32> -> vector<8x512xf32>
    %20 = math.exp %19 : vector<8x512xf32>
    %21 = vector.extract_strided_slice %20 {offsets = [0, 0], sizes = [4, 512], strides = [1, 1]} : vector<8x512xf32> to vector<4x512xf32>
    %cst_8 = arith.constant dense<0.000000e+00> : vector<512xf32>
    %22 = vector.multi_reduction <add>, %21, %cst_8 [0] : vector<4x512xf32> to vector<512xf32>
    %23 = vector.shape_cast %22 : vector<512xf32> to vector<1x512xf32>
    %24 = vector.extract_strided_slice %20 {offsets = [4, 0], sizes = [4, 512], strides = [1, 1]} : vector<8x512xf32> to vector<4x512xf32>
    %cst_9 = arith.constant dense<0.000000e+00> : vector<512xf32>
    %25 = vector.multi_reduction <add>, %24, %cst_9 [0] : vector<4x512xf32> to vector<512xf32>
    %26 = vector.shape_cast %25 : vector<512xf32> to vector<1x512xf32>
    %c0_10 = arith.constant 0 : index
    %c0_11 = arith.constant 0 : index
    %27 = vector.load %arg6[%c0_10, %c0_11] : memref<1x512xf32, #tpu.memory_space<vmem>>, vector<1x512xf32>
    %28 = arith.mulf %23, %26 : vector<1x512xf32>
    %29 = math.log %28 : vector<1x512xf32>
    %30 = arith.addf %29, %12 : vector<1x512xf32>
    %31 = arith.addf %30, %14 : vector<1x512xf32>
    %32 = arith.addf %27, %31 : vector<1x512xf32>
    %c0_12 = arith.constant 0 : index
    %c0_13 = arith.constant 0 : index
    %33 = vector.load %arg6[%c0_12, %c0_13] : memref<1x512xf32, #tpu.memory_space<vmem>>, vector<1x512xf32>
    tpu.vector_store %arg6[%c0_12, %c0_13], %32 {strides = array<i32>} : memref<1x512xf32, #tpu.memory_space<vmem>>, vector<1x512xf32>,
    %c4_i32 = arith.constant 4 : i32
    %34 = arith.cmpi eq, %arg1, %c4_i32 : i32
    %35 = arith.extui %34 : i1 to i32
    %c0_i32_14 = arith.constant 0 : i32
    %36 = arith.cmpi ne, %35, %c0_i32_14 : i32
    scf.if %36 {
      %c0_15 = arith.constant 0 : index
      %c0_16 = arith.constant 0 : index
      %37 = vector.load %arg6[%c0_15, %c0_16] : memref<1x512xf32, #tpu.memory_space<vmem>>, vector<1x512xf32>
      %38 = vector.extract_strided_slice %37 {offsets = [0, 0], sizes = [1, 128], strides = [1, 1]} : vector<1x512xf32> to vector<1x128xf32>
      %39 = vector.extract_strided_slice %37 {offsets = [0, 128], sizes = [1, 128], strides = [1, 1]} : vector<1x512xf32> to vector<1x128xf32>
      %40 = arith.addf %38, %39 : vector<1x128xf32>
      %41 = vector.extract_strided_slice %37 {offsets = [0, 256], sizes = [1, 128], strides = [1, 1]} : vector<1x512xf32> to vector<1x128xf32>
      %42 = arith.addf %40, %41 : vector<1x128xf32>
      %43 = vector.extract_strided_slice %37 {offsets = [0, 384], sizes = [1, 128], strides = [1, 1]} : vector<1x512xf32> to vector<1x128xf32>
      %44 = arith.addf %42, %43 : vector<1x128xf32>
      %45 = vector.shape_cast %44 : vector<1x128xf32> to vector<1x1x128xf32>
      %c0_17 = arith.constant 0 : index
      %c0_18 = arith.constant 0 : index
      %c0_19 = arith.constant 0 : index
      %46 = vector.load %arg5[%c0_17, %c0_18, %c0_19] : memref<1x1x128xf32, #tpu.memory_space<vmem>>, vector<1x1x128xf32>
      tpu.vector_store %arg5[%c0_17, %c0_18, %c0_19], %45 {strides = array<i32>} : memref<1x1x128xf32, #tpu.memory_space<vmem>>, vector<1x1x128xf32>,
    } else {
    }
    return
  }
  func.func @transform_0(%arg0: i32, %arg1: i32) -> (i32, i32) {
    %c0_i32 = arith.constant 0 : i32
    %c0_i32_0 = arith.constant 0 : i32
    return %c0_i32, %arg0 : i32, i32
  }
  func.func @transform_1(%arg0: i32, %arg1: i32) -> (i32, i32) {
    %c0_i32 = arith.constant 0 : i32
    %c0_i32_0 = arith.constant 0 : i32
    return %c0_i32, %arg0 : i32, i32
  }
  func.func @transform_2(%arg0: i32, %arg1: i32) -> (i32, i32, i32) {
    %c0_i32 = arith.constant 0 : i32
    %c0_i32_0 = arith.constant 0 : i32
    return %arg1, %c0_i32, %arg0 : i32, i32, i32
  }
  func.func @transform_3(%arg0: i32, %arg1: i32) -> (i32, i32, i32) {
    %c0_i32 = arith.constant 0 : i32
    %c0_i32_0 = arith.constant 0 : i32
    %c0_i32_1 = arith.constant 0 : i32
    return %arg0, %c0_i32, %c0_i32_0 : i32, i32, i32
  }
}

</mosaic_0001>

<bundles_post_ra>
// kernel: tpu_custom_call.1
= control target key start
LH: loop header
LB: loop body
LE: loop exit
PB: predicated region body
PF: predicated region fallthrough
CT: control target
= control target key end

     0   :  { %8 = vsyncpa [#allocation4], 0  ;;  %s1152_s0 = inlined_call_operand.hbm [shape: f32[4,512], index: 0, kind: input, shape index: {}]   ;;  %s1153_s1 = inlined_call_operand.hbm [shape: f32[4,512], index: 1, kind: input, shape index: {}]   ;;  %s1154_s2 = inlined_call_operand.hbm [shape: bf16[5,4,512], index: 2, kind: input, shape index: {}]   ;;  %s1155_s3 = inlined_call_operand.hbm [shape: f32[1,1,128], index: 3, kind: output, shape index: {}]  }
   0x1   :  { %9 = vsyncpa [#allocation7], 0 }
   0x2   :  { %10 = vsyncpa [#allocation5], 0  ;;  %s958_s12 = smov 0   ;;  %s960_s13 = smov 0  }
   0x3   :  { %s962_s14 = smov 0   ;;  %s964_s15 = smov 0  }
   0x4   :  { %s966_s16 = smov 0   ;;  %s968_s17 = smov 0  }
   0x5 LB: > { %s987_s18 = sadd.s32 4294967295, %s932_s17   ;;  %p102_p0 = scmp.ne.s32.totalorder %s916_s13, %s912_s12  ;;  %s932_s17 = sphi %s968_s17, %s16_s17   ;;  %s928_s16 = sphi %s966_s16, %s1164_s16   ;;  %s924_s15 = sphi %s964_s15, %s1163_s15   ;;  %s920_s14 = sphi %s962_s14, %s1162_s14   ;;  %s916_s13 = sphi %s960_s13, %s1161_s13   ;;  %s912_s12 = sphi %s958_s12, %s1160_s12  }
   0x6   : > { %p103_p1 = scmp.eq.s32.totalorder %s987_s18, 0  ;;  %p634_p2 = scmp.ge.s32.totalorder %s932_s17, 1 }
   0x7   : > { %p139_p3 = scmp.lt.s32.totalorder %s932_s17, 6  ;;  %s154_s22 = sshll.u32 %s1152_s0, 4  ;;  %s155_s22 = int_to_ptr.hbm [resolvable:$true] %s154_s22 }
   0x8   : > { %p995_p4 = por %p103_p1, %p102_p0  ;;  %s934_s24 = smov [#allocation3]  }
   0x9   : > { %p1002_p5 = pnand %p634_p2, %p139_p3  ;;  %s156_s25 = sshll.u32 %s934_s24, 4  ;;  %s157_s25 = int_to_ptr.vmem [resolvable:$true] %s156_s25 }
   0xa   : > { %s169_s28 = sshll.u32 %s1153_s1, 4  ;;  %s935_s29 = smov [#allocation6]   ;;  %s170_s28 = int_to_ptr.hbm [resolvable:$true] %s169_s28 }
   0xb   : > { %p666_p6 = pneg %p1002_p5  ;;  %s171_s30 = sshll.u32 %s935_s29, 4  ;;  %s172_s30 = int_to_ptr.vmem [resolvable:$true] %s171_s30 }
   0xc   : > { %s25_s4 = sadd.s32 1, %s928_s16  ;;  %p96_p9 = scmp.ne.s32.totalorder %s920_s14, %s916_s13 }
   0xd   : > { %p667_p7 = pnand %p666_p6, %p103_p1  ;;  %p26_p8 = scmp.ge.s32.totalorder %s25_s4, 5 }
   0xe   : > { %s89_s5 = sadd.s32 1, %s920_s14  ;;  %p97_p10 = scmp.eq.s32.totalorder %s932_s17, 0 }
   0xf   : > { %669 = dma.hbm_to_vmem [thread:$0]  (!%p667_p7), %s155_s22, 256, %s157_s25, [#allocation4]  }
  0x10   : > { %672 = dma.hbm_to_vmem [thread:$0]  (!%p667_p7), %s170_s28, 256, %s172_s30, [#allocation7]  }
  0x11   : > { %s1166_s4 = smov (%p26_p8, %s25_s4), 0  ;;  %p1020_p11 = por %p97_p10, %p96_p9 }
  0x12   : > { %p679_p12 = scmp.lt.s32.totalorder %s932_s17, 5  ;;  %s84_s7 = ssub.s32 %s928_s16, %s1166_s4 }
  0x13   : > { %s182_s8 = sand.u32 1, %s932_s17   ;;  %p87_p13 = scmp.eq.s32.totalorder %s84_s7, 0 }
  0x14   : > { %s184_s9 = sand.u32 1, %s920_s14   ;;  %s651_s11 = sshll.u32 %s928_s16, 3 }
  0x15   : > { %s638_s10 = sshll.u32 %s184_s9, 3  ;;  %s193_s22 = scalar_lea.hbm %s1154_s2, %s651_s11 }
  0x16   : > { %s1031_s12 = scalar_select %p87_p13, %s920_s14, %s89_s5  }
  0x17   : > { %s195_s24 = sshll.u32 %s193_s22, 4  ;;  %s186_s25 = scalar_lea.vmem [#allocation8], %s638_s10  ;;  %s196_s24 = int_to_ptr.hbm [resolvable:$true] %s195_s24 }
  0x18   : > { %s197_s26 = sshll.u32 %s186_s25, 4  ;;  %p674_p0 = pnand %p679_p12, %p1020_p11  ;;  %s198_s26 = int_to_ptr.vmem [resolvable:$true] %s197_s26 }
  0x19   : > { %s183_s27 = scalar_lea.sflag [#allocation4], %s182_s8  ;;  %206 = sbr.rel (%p1002_p5) target bundleno = 174 (0xae), region = 32 }
  0x1a   : > { %676 = dma.hbm_to_vmem [thread:$0]  (!%p674_p0), %s196_s24, 128, %s198_s26, %s183_s27  }
  0x1e   : > { %895 = dma.done.wait (%p103_p1), [#allocation4], 256  }
  0x1f   : > { %897 = vsyncadd (%p103_p1), [#allocation4], 4294967040 }
  0x20   : > { %899 = dma.done.wait (%p103_p1), [#allocation7], 256  }
  0x21   : > { %901 = vsyncadd (%p103_p1), [#allocation7], 4294967040  ;;  %s218_s28 = sand.u32 1, %s987_s18   ;;  %s220_s29 = sand.u32 1, %s916_s13  }
  0x22   : > { %s644_s30 = sshll.u32 %s220_s29, 3  ;;  %s219_s23 = scalar_lea.sflag [#allocation4], %s218_s28 }
  0x23   : > { %s222_s5 = scalar_lea.vmem [#allocation8], %s644_s30 }
  0x24   : > { %903 = dma.done.wait (%p995_p4), %s219_s23, 128  }
  0x25   : > { %905 = vsyncadd (%p995_p4), %s219_s23, 4294967168  ;;  %p645_p2 = scmp.ne.s32.totalorder %s924_s15, 0 }
  0x27   : > { %247 = sbr.rel (%p645_p2) target bundleno = 48 (0x30), region = 48 }
  0x2c   : > { %v248_v0 = vlaneseq  ;;  %v936_v1 = vmov 0.0  }
  0x2e   : > { %vm250_vm0 = vcmp.lt.s32.totalorder %v248_v0, 512 }
  0x2f   : > { %252 = vst.msk [vmem:[#allocation2] sm:$0xf] %vm250_vm0, %v936_v1 }
  0x30 PF: > { %v255_v2 = vld [vmem:[#allocation6] sm:$0xff]  ;;  %v257_v3 = vld [vmem:[%s222_s5] sm:$0xff]  ;;  %v256_v5 = vld [vmem:[#allocation6 + $0x8] sm:$0xff]  ;;  %vm279_vm1 = vcmask 1043456   ;;  %vm508_vm2 = vcmask 1040384   ;;  %vm510_vm3 = vcmask 1042434  }
  0x31   : > { %v258_v4 = vunpack.c.l.bf16 %v257_v3  ;;  %v259_v6 = vunpack.c.h.bf16 %v257_v3  ;;  %v253_v7 = vld [vmem:[#allocation3] sm:$0xff]  ;;  %v254_v8 = vld [vmem:[#allocation3 + $0x8] sm:$0xff]  ;;  %vm512_vm4 = vcmask 1041408   ;;  %p646_p1 = scmp.ne.s32.totalorder %s924_s15, 4 }
  0x33   : > { %v260_v9 = vmul.f32 %v258_v4, %v255_v2  ;;  %v261_v10 = vmul.f32 %v259_v6, %v256_v5 }
  0x35   : > { %v1057_v11 = vadd.f32 %v260_v9, %v253_v7  ;;  %v1059_v12 = vadd.f32 %v261_v10, %v254_v8  ;;  %v1063_v13 = vsub.f32 %v253_v7, %v260_v9  ;;  %v1065_v16 = vsub.f32 %v254_v8, %v261_v10 }
  0x37   : > { %268 = vst [vmem:[#allocation1] ss:$2 sm:$0xff] %v1057_v11 }
  0x38   : > { %270 = vst [vmem:[#allocation1 + $0x10] ss:$2 sm:$0xff] %v1059_v12 }
  0x3e   : > { %v271_v14 = vld.sshfl [vmem:[#allocation1] sm:$0xff pattern:$0x75316420]  ;;  %v272_v15 = vld.sshfl [vmem:[#allocation1 + $0x8] sm:$0xff pattern:$0x75316420] }
  0x3f   : > { %v280_v17 = vsel %vm279_vm1, %v271_v14, -inf  ;;  %v287_v18 = vsel %vm279_vm1, %v272_v15, -inf  ;;  %310 = vst [vmem:[#allocation1] ss:$2 sm:$0xff] %v1063_v13 }
  0x40   : > { %v281_v19 = vrot.slane %v280_v17, 4  ;;  %v288_v20 = vrot.slane %v287_v18, 4  ;;  %v273_v21 = vld.sshfl [vmem:[#allocation1 + $0x10] sm:$0xff pattern:$0x75316420] }
  0x41   : > { %v274_v22 = vld.sshfl [vmem:[#allocation1 + $0x18] sm:$0xff pattern:$0x75316420]  ;;  %v294_v23 = vsel %vm279_vm1, %v273_v21, -inf }
  0x42   : > { %v282_v24 = vmax.f32 %v280_v17, %v281_v19  ;;  %v289_v25 = vmax.f32 %v287_v18, %v288_v20  ;;  %v295_v26 = vrot.slane %v294_v23, 4  ;;  %v301_v27 = vsel %vm279_vm1, %v274_v22, -inf  ;;  %312 = vst [vmem:[#allocation1 + $0x10] ss:$2 sm:$0xff] %v1065_v16 }
  0x43   : > { %v302_v28 = vrot.slane %v301_v27, 4 }
  0x44   : > { %v283_v29 = vrot.slane %v282_v24, 2  ;;  %v290_v30 = vrot.slane %v289_v25, 2  ;;  %v296_v31 = vmax.f32 %v294_v23, %v295_v26 }
  0x45   : > { %v303_v32 = vmax.f32 %v301_v27, %v302_v28 }
  0x46   : > { %v284_v33 = vmax.f32 %v282_v24, %v283_v29  ;;  %v291_v34 = vmax.f32 %v289_v25, %v290_v30  ;;  %v297_v35 = vrot.slane %v296_v31, 2  ;;  %v313_v36 = vld.sshfl [vmem:[#allocation1] sm:$0xff pattern:$0x75316420] }
  0x47   : > { %v304_v37 = vrot.slane %v303_v32, 2  ;;  %v314_v38 = vld.sshfl [vmem:[#allocation1 + $0x8] sm:$0xff pattern:$0x75316420]  ;;  %v321_v39 = vsel %vm279_vm1, %v313_v36, -inf }
  0x48   : > { %v285_v40 = vrot.slane %v284_v33, 1  ;;  %v292_v41 = vrot.slane %v291_v34, 1  ;;  %v298_v42 = vmax.f32 %v296_v31, %v297_v35  ;;  %v322_v43 = vrot.slane %v321_v39, 4 }
  0x49   : > { %v305_v44 = vmax.f32 %v303_v32, %v304_v37  ;;  %v328_v45 = vsel %vm279_vm1, %v314_v38, -inf  ;;  %v315_v46 = vld.sshfl [vmem:[#allocation1 + $0x10] sm:$0xff pattern:$0x75316420] }
  0x4a   : > { %v1075_v47 = vmax.f32 %v291_v34, %v292_v41  ;;  %v299_v48 = vrot.slane %v298_v42, 1  ;;  %v323_v49 = vmax.f32 %v321_v39, %v322_v43  ;;  %v316_v50 = vld.sshfl [vmem:[#allocation1 + $0x18] sm:$0xff pattern:$0x75316420]  ;;  %v329_v52 = vrot.slane %v328_v45, 4 }
  0x4b   : > { %v306_v51 = vrot.slane %v305_v44, 1  ;;  %v335_v53 = vsel %vm279_vm1, %v315_v46, -inf  ;;  %v342_v54 = vsel %vm279_vm1, %v316_v50, -inf  ;;  %v1079_v55 = vmax.f32 %v284_v33, %v285_v40 }
  0x4c   : > { %v353_v56 = vrot.slane %v1075_v47, 4  ;;  %v324_v57 = vrot.slane %v323_v49, 2  ;;  %v336_v58 = vrot.slane %v335_v53, 4  ;;  %v330_v60 = vmax.f32 %v328_v45, %v329_v52 }
  0x4d   : > { %v1082_v59 = vmax.f32 %v305_v44, %v306_v51  ;;  %v343_v61 = vrot.slane %v342_v54, 4  ;;  %v1086_v63 = vmax.f32 %v298_v42, %v299_v48 }
  0x4e   : > { %v355_v62 = vsel %vm279_vm1, %v1079_v55, %v353_v56  ;;  %v325_v0 = vmax.f32 %v323_v49, %v324_v57  ;;  %v337_v1 = vmax.f32 %v335_v53, %v336_v58  ;;  %v331_v4 = vrot.slane %v330_v60, 2 }
  0x4f   : > { %v359_v2 = vsub.f32 %v1057_v11, %v355_v62  ;;  %v354_v3 = vrot.slane %v1082_v59, 4  ;;  %v344_v5 = vmax.f32 %v342_v54, %v343_v61 }
  0x50   : > { %v338_v6 = vrot.slane %v337_v1, 2  ;;  %v332_v8 = vmax.f32 %v330_v60, %v331_v4  ;;  %v326_v15 = vrot.slane %v325_v0, 1 }
  0x51   : > { %v356_v7 = vsel %vm279_vm1, %v1086_v63, %v354_v3  ;;  %375 = vst [vmem:[#allocation1] ss:$2 sm:$0xff] %v359_v2  ;;  %v345_v9 = vrot.slane %v344_v5, 2 }
  0x52   : > { %v360_v10 = vsub.f32 %v1059_v12, %v356_v7  ;;  %v339_v14 = vmax.f32 %v337_v1, %v338_v6  ;;  %v333_v17 = vrot.slane %v332_v8, 1  ;;  %v1095_v21 = vmax.f32 %v325_v0, %v326_v15 }
  0x53   : > { %v346_v18 = vmax.f32 %v344_v5, %v345_v9 }
  0x54   : > { %377 = vst [vmem:[#allocation1 + $0x10] ss:$2 sm:$0xff] %v360_v10  ;;  %v1093_v19 = vmax.f32 %v332_v8, %v333_v17  ;;  %v340_v11 = vrot.slane %v339_v14, 1 }
  0x55   : > { %v347_v20 = vrot.slane %v346_v18, 1 }
  0x56   : > { %v365_v22 = vrot.slane %v1093_v19, 4  ;;  %v1102_v12 = vmax.f32 %v339_v14, %v340_v11 }
  0x57   : > { %v1098_v23 = vmax.f32 %v346_v18, %v347_v20 }
  0x58   : > { %v378_v24 = vld.sshfl [vmem:[#allocation1] sm:$0xff pattern:$0x75316420]  ;;  %v367_v25 = vsel %vm279_vm1, %v1095_v21, %v365_v22  ;;  %v379_v27 = vld.sshfl [vmem:[#allocation1 + $0x8] sm:$0xff pattern:$0x75316420] }
  0x59   : > { %v366_v26 = vrot.slane %v1098_v23, 4  ;;  %v371_v28 = vsub.f32 %v1063_v13, %v367_v25 }
  0x5b   : > { %v368_v29 = vsel %vm279_vm1, %v1102_v12, %v366_v26  ;;  %v380_v30 = vld.sshfl [vmem:[#allocation1 + $0x10] sm:$0xff pattern:$0x75316420]  ;;  %v381_v31 = vld.sshfl [vmem:[#allocation1 + $0x18] sm:$0xff pattern:$0x75316420] }
  0x5c   : > { %v372_v32 = vsub.f32 %v1065_v16, %v368_v29  ;;  %389 = vst [vmem:[#allocation1 + $0x1] ss:$2 sm:$0xff] %v371_v28 }
  0x5e   : > { %391 = vst [vmem:[#allocation1 + $0x11] ss:$2 sm:$0xff] %v372_v32 }
  0x63   : > { %v392_v33 = vld.sshfl [vmem:[#allocation1] sm:$0xff pattern:$0x75316420]  ;;  %v393_v34 = vld.sshfl [vmem:[#allocation1 + $0x8] sm:$0xff pattern:$0x75316420] }
  0x64   : > { %v400_v35 = vsel %vm279_vm1, %v378_v24, %v392_v33  ;;  %v401_v36 = vsel %vm279_vm1, %v379_v27, %v393_v34 }
  0x65   : > { %v404_v37 = vmul.f32 1.442695, %v400_v35  ;;  %v406_v38 = vmul.f32 1.442695, %v401_v36 }
  0x66   : > { %v394_v39 = vld.sshfl [vmem:[#allocation1 + $0x10] sm:$0xff pattern:$0x75316420]  ;;  %v395_v40 = vld.sshfl [vmem:[#allocation1 + $0x18] sm:$0xff pattern:$0x75316420] }
  0x67   : > { %736 = vpow2.f32 %v404_v37  ;;  %v402_v13 = vsel %vm279_vm1, %v380_v30, %v394_v39  ;;  %v403_v41 = vsel %vm279_vm1, %v381_v31, %v395_v40 }
  0x68   : > { %738 = vpow2.f32 %v406_v38  ;;  %v408_v42 = vmul.f32 1.442695, %v402_v13  ;;  %v410_v16 = vmul.f32 1.442695, %v403_v41 }
  0x6a   : > { %740 = vpow2.f32 %v408_v42 }
  0x6b   : > { %742 = vpow2.f32 %v410_v16 }
  0x6d   : > { %v737_v43 = vpop.eup %736 }
  0x6e   : > { %v739_v44 = vpop.eup %738  ;;  %v412_v45 = vsel %vm279_vm1, %v737_v43, 0.0  ;;  %v444_v46 = vrot.slane %v737_v43, 4 }
  0x6f   : > { %v413_v48 = vrot.slane %v412_v45, 4  ;;  %v419_v49 = vsel %vm279_vm1, %v739_v44, 0.0  ;;  %v445_v50 = vrot.slane %v739_v44, 4 }
  0x70   : > { %v741_v51 = vpop.eup %740  ;;  %v420_v52 = vrot.slane %v419_v49, 4  ;;  %v452_v53 = vsel %vm279_vm1, %v444_v46, 0.0 }
  0x71   : > { %v743_v54 = vpop.eup %742  ;;  %v459_v56 = vsel %vm279_vm1, %v445_v50, 0.0  ;;  %v426_v57 = vsel %vm279_vm1, %v741_v51, 0.0  ;;  %v446_v58 = vrot.slane %v741_v51, 4  ;;  %v414_v60 = vadd.f32 %v413_v48, %v412_v45 }
  0x72   : > { %v421_v61 = vadd.f32 %v420_v52, %v419_v49  ;;  %v460_v62 = vrot.slane %v459_v56, 4  ;;  %v427_v0 = vrot.slane %v426_v57, 4  ;;  %v433_v1 = vsel %vm279_vm1, %v743_v54, 0.0 }
  0x73   : > { %v434_v2 = vrot.slane %v433_v1, 4  ;;  %v447_v3 = vrot.slane %v743_v54, 4  ;;  %v466_v4 = vsel %vm279_vm1, %v446_v58, 0.0  ;;  %v415_v5 = vrot.slane %v414_v60, 2 }
  0x74   : > { %v428_v6 = vadd.f32 %v427_v0, %v426_v57  ;;  %v467_v7 = vrot.slane %v466_v4, 4  ;;  %v422_v8 = vrot.slane %v421_v61, 2  ;;  %v453_v9 = vrot.slane %v452_v53, 4 }
  0x75   : > { %v435_v10 = vadd.f32 %v434_v2, %v433_v1  ;;  %v473_v14 = vsel %vm279_vm1, %v447_v3, 0.0  ;;  %v416_v15 = vadd.f32 %v415_v5, %v414_v60  ;;  %v461_v17 = vadd.f32 %v460_v62, %v459_v56 }
  0x76   : > { %v474_v18 = vrot.slane %v473_v14, 4  ;;  %v423_v11 = vadd.f32 %v422_v8, %v421_v61  ;;  %v429_v20 = vrot.slane %v428_v6, 2  ;;  %v454_v22 = vadd.f32 %v453_v9, %v452_v53 }
  0x77   : > { %v436_v24 = vrot.slane %v435_v10, 2  ;;  %v462_v25 = vrot.slane %v461_v17, 2  ;;  %v468_v26 = vadd.f32 %v467_v7, %v466_v4  ;;  %v417_v34 = vrot.slane %v416_v15, 1 }
  0x78   : > { %v430_v27 = vadd.f32 %v429_v20, %v428_v6  ;;  %v455_v28 = vrot.slane %v454_v22, 2  ;;  %v475_v29 = vadd.f32 %v474_v18, %v473_v14  ;;  %v424_v30 = vrot.slane %v423_v11, 1 }
  0x79   : > { %v437_v31 = vadd.f32 %v436_v24, %v435_v10  ;;  %v463_v32 = vadd.f32 %v462_v25, %v461_v17  ;;  %v469_v33 = vrot.slane %v468_v26, 2  ;;  %v418_v44 = vadd.f32 %v417_v34, %v416_v15 }
  0x7a   : > { %v456_v35 = vadd.f32 %v455_v28, %v454_v22  ;;  %v476_v36 = vrot.slane %v475_v29, 2  ;;  %v431_v37 = vrot.slane %v430_v27, 1  ;;  %v425_v42 = vadd.f32 %v424_v30, %v423_v11 }
  0x7b   : > { %v464_v38 = vrot.slane %v463_v32, 1  ;;  %v470_v39 = vadd.f32 %v469_v33, %v468_v26  ;;  %v438_v40 = vrot.slane %v437_v31, 1 }
  0x7c   : > { %v457_v13 = vrot.slane %v456_v35, 1  ;;  %v477_v41 = vadd.f32 %v476_v36, %v475_v29  ;;  %v432_v48 = vadd.f32 %v431_v37, %v430_v27 }
  0x7d   : > { %v465_v16 = vadd.f32 %v464_v38, %v463_v32  ;;  %v471_v43 = vrot.slane %v470_v39, 1  ;;  %v439_v51 = vadd.f32 %v438_v40, %v437_v31 }
  0x7e   : > { %v458_v45 = vadd.f32 %v457_v13, %v456_v35  ;;  %v478_v46 = vrot.slane %v477_v41, 1 }
  0x7f   : > { %v472_v49 = vadd.f32 %v471_v43, %v470_v39  ;;  %v482_v50 = vmul.f32 %v465_v16, %v425_v42 }
  0x80   : > { %v479_v52 = vadd.f32 %v478_v46, %v477_v41  ;;  %v481_v53 = vmul.f32 %v458_v45, %v418_v44 }
  0x81   : > { %v483_v54 = vmul.f32 %v472_v49, %v432_v48  ;;  %744 = vlog2.f32 %v482_v50 }
  0x82   : > { %v484_v56 = vmul.f32 %v479_v52, %v439_v51  ;;  %746 = vlog2.f32 %v481_v53 }
  0x83   : > { %748 = vlog2.f32 %v483_v54 }
  0x84   : > { %750 = vlog2.f32 %v484_v56 }
  0x87   : > { %v745_v57 = vpop.eup %744 }
  0x88   : > { %v747_v58 = vpop.eup %746  ;;  %v488_v60 = vmul.f32 0.6931472, %v745_v57 }
  0x89   : > { %v749_v61 = vpop.eup %748  ;;  %v486_v62 = vmul.f32 0.6931472, %v747_v58 }
  0x8a   : > { %v751_v0 = vpop.eup %750  ;;  %v490_v1 = vmul.f32 0.6931472, %v749_v61  ;;  %v494_v2 = vadd.f32 %v488_v60, %v1075_v47  ;;  %v516_v47 = vlaneseq }
  0x8b   : > { %v492_v3 = vmul.f32 0.6931472, %v751_v0  ;;  %v493_v4 = vadd.f32 %v486_v62, %v1079_v55  ;;  %v480_v55 = vld [vmem:[#allocation2] sm:$0xf] }
  0x8c   : > { %v495_v5 = vadd.f32 %v490_v1, %v1086_v63  ;;  %v498_v6 = vadd.f32 %v494_v2, %v1093_v19  ;;  %vm518_vm5 = vcmp.lt.s32.totalorder %v516_v47, 512 }
  0x8d   : > { %v496_v7 = vadd.f32 %v492_v3, %v1082_v59  ;;  %v497_v8 = vadd.f32 %v493_v4, %v1095_v21 }
  0x8e   : > { %v499_v9 = vadd.f32 %v495_v5, %v1102_v12  ;;  %v505_v10 = vrot.slane %v498_v6, 7 }
  0x8f   : > { %v500_v14 = vadd.f32 %v496_v7, %v1098_v23 }
  0x90   : > { %v506_v15 = vrot.slane %v499_v9, 6  ;;  %v509_v17 = vsel %vm508_vm2, %v497_v8, %v505_v10 }
  0x91   : > { %v507_v18 = vrot.slane %v500_v14, 5 }
  0x93   : > { %v511_v63 = vsel %vm510_vm3, %v506_v15, %v507_v18  ;;  %524 = sbr.rel (%p646_p1) target bundleno = 168 (0xa8), region = 52 }
  0x94   : > { %v513_v11 = vsel %vm512_vm4, %v509_v17, %v511_v63 }
  0x95   : > { %v515_v19 = vadd.f32 %v513_v11, %v480_v55 }
  0x97   : > { %520 = vst.msk [vmem:[#allocation2] sm:$0xf] %vm518_vm5, %v515_v19 }
  0x9e   : > { %v525_v59 = vld [vmem:[#allocation2] sm:$0xf] }
  0x9f   : > { %v527_v21 = vrot.slane %v525_v59, 1  ;;  %v530_v12 = vrot.slane %v525_v59, 2  ;;  %v533_v23 = vrot.slane %v525_v59, 3 }
  0xa1   : > { %v529_v20 = vadd.f32 %v527_v21, %v525_v59 }
  0xa3   : > { %v532_v22 = vadd.f32 %v530_v12, %v529_v20 }
  0xa5   : > { %v535_v24 = vadd.f32 %v533_v23, %v532_v22 }
  0xa7   : > { %536 = vst [vmem:[#allocation9] sm:$0x1] %v535_v24 }
  0xa8 PF: > { %p682_p3 = scmp.eq.s32.totalorder %s987_s18, 4  ;;  %s546_s7 = sshll.u32 %s1155_s3, 4  ;;  %s547_s7 = int_to_ptr.hbm [resolvable:$true] %s546_s7 }
  0xa9   : > { %s937_s8 = smov [#allocation9]  }
  0xaa   : > { %s544_s9 = sshll.u32 %s937_s8, 4  ;;  %s545_s9 = int_to_ptr.vmem [resolvable:$true] %s544_s9 }
  0xab   : > { %663 = dma.vmem_to_hbm [thread:$0]  (%p682_p3), %s545_s9, 16, %s547_s7, [#allocation5]  }
  0xac   : > { %907 = dma.done.wait (%p682_p3), [#allocation5], 16  }
  0xad   : > { %909 = vsyncadd (%p682_p3), [#allocation5], 4294967280 }
  0xae PF: > { %s16_s17 = sadd.s32 1, %s932_s17   ;;  %s1159_s15 = smov %s1031_s12 }
  0xaf   : > { %p13_p4 = scmp.ge.s32.totalorder %s16_s17, 7   ;;  %s1160_s12 = smov %s916_s13 }
  0xb0   : > { %s1161_s13 = smov %s920_s14  ;;  %s1162_s14 = smov %s1159_s15 }
  0xb1   : > { %s1163_s15 = smov %s928_s16  ;;  %s1164_s16 = smov %s1166_s4 }
  0xb2   :  { %15 = sbr.rel (!%p13_p4) target bundleno = 5 (0x5), region = 92 }
  0xb7   :  { %560 = vsyncpa [#allocation4], 1 }
  0xb8   :  { %562 = vsyncpa [#allocation4 + $0x1], 1 }
  0xb9   :  { %563 = vsyncpa [#allocation7], 1 }
  0xba   :  { %564 = vsyncpa [#allocation5], 1 }
  0xbb   :  { %566 = vsyncpa [#allocation5 + $0x1], 1 }

</bundles_post_ra>
